<compile_context>
chip_gen: v6e
topology: v6e:2x2x1
jax: 0.10.0
libtpu: 0.0.40
codegen_flags: <defaults>
</compile_context>

<pallas_src>
import jax
import jax.numpy as jnp
from jax import lax
from jax.experimental import pallas as pl
from jax.experimental.pallas import tpu as pltpu

BN_EPS = 1e-5
_INV_SQRT2 = 0.7071067811865476


# ----------------------------------------------------------------------------
# Parameter packing: fold the W axis into the lane axis once, ahead of time.
# ----------------------------------------------------------------------------
def pack_params(p, W):
    """PyTorch-convention conv/BN params -> W-folded, lane-dense matrices.

      conv1x1 / conv1x1end -> kron(I_W, w.T)                : (W*Cin, W*Cout)
      conv3x3              -> 3 banded matrices (per dy)    : (3, W*Cout, W*Cout)
      biases               -> tiled over W on the lane axis : (1, W*Cout)
    """
    w1 = p["w1"][:, :, 0, 0]            # (Cout, Cin)
    w5 = p["w5"][:, :, 0, 0]            # (Cout, Cout)
    w3 = p["w3"]                        # (Cout, Cout, 3, 3)
    cout = w1.shape[0]

    eye_w = jnp.eye(W, dtype=jnp.float32)
    m1 = jnp.kron(eye_w, w1.T)                                  # (W*Cin,  W*Cout)
    m5 = jnp.kron(eye_w, w5.T)                                  # (W*Cout, W*Cout)

    m3 = []
    for i in range(3):                                          # kernel row (dy = i-1)
        m = jnp.zeros((W * cout, W * cout), jnp.float32)
        for j in range(3):                                      # kernel col (dx = j-1)
            band = jnp.eye(W, W, 1 - j, dtype=jnp.float32)      # band[w',w]=1 iff w'=w+j-1
            m = m + jnp.kron(band, w3[:, :, i, j].T)
        m3.append(m)
    m3 = jnp.stack(m3)                                          # (3, W*Cout, W*Cout)

    tile_w = lambda v: jnp.tile(v.reshape(1, -1), (1, W)).astype(jnp.float32)

    return dict(
        m1=m1.astype(jnp.bfloat16), b1t=tile_w(p["b1"]),
        m3=m3.astype(jnp.bfloat16), b3t=tile_w(p["b3"]),
        m5=m5.astype(jnp.bfloat16), b5t=tile_w(p["b5"]),
        gamma=p["gamma"].astype(jnp.float32), beta=p["beta"].astype(jnp.float32),
    )


# ----------------------------------------------------------------------------
# Forward pass
# ----------------------------------------------------------------------------
def cnn_block_forward(x_nchw, packed):
    """x_nchw: (B, Cin, H, W) float32 -> (B, Cout, H, W) float32."""
    B, Cin, H, W = x_nchw.shape
    WCout = packed["m5"].shape[1]
    Cout = WCout // W
    WCin = W * Cin
    BH = B * H

    # Lane-dense layout: (B*H, W*C).  Matmul operands bf16, f32 accumulate.
    x2d = jnp.transpose(x_nchw, (0, 2, 3, 1)).reshape(BH, WCin).astype(jnp.bfloat16)

    # Tile over whole images (no H halo across tiles; image top/bottom rows are
    # handled with in-kernel masks).
    # TODO(synk): for large H*W*C add H-row tiling with a 1-row halo and channel tiling.
    tile_b = 1 if H % 8 == 0 else B
    nb = B // tile_b
    R = tile_b * H                      # rows per tile

    cparams = pltpu.CompilerParams(
        dimension_semantics=("parallel",),           # shard tiles across TCs (v7x)
        vmem_limit_bytes=32 * 1024 * 1024,           # explicit budget incl. double-buffering
    )

    # ------------- kernel 1: conv1x1 -> conv3x3 (+ BN partial sums) ----------
    def conv_stage_kernel(x_ref, m1_ref, b1t_ref, m3_ref, b3t_ref,
                          y3_ref, stats_ref, y1pad_ref):
        # conv1x1: one lane-dense matmul against the block-diagonal weight.
        y1 = jnp.dot(x_ref[...], m1_ref[...],
                     preferred_element_type=jnp.float32) + b1t_ref[...]

        # conv3x3: write y1 once into an (R+2)-row scratch (zero only the 1-row
        # halo), then 3 banded matmuls on row-shifted views (dy = -1, 0, +1).
        zrow = jnp.zeros((1, WCout), jnp.float32)
        y1pad_ref[0:1, :] = zrow
        y1pad_ref[R + 1:R + 2, :] = zrow
        y1pad_ref[1:R + 1, :] = y1

        hmod = lax.broadcasted_iota(jnp.int32, (R, 1), 0) % H    # row within image
        acc = None
        for i in range(3):                       # tap i reads rows r + (i - 1)
            s = y1pad_ref[i:i + R, :]
            if i == 0:
                s = jnp.where(hmod > 0, s, 0.0)          # no row above h == 0
            elif i == 2:
                s = jnp.where(hmod < H - 1, s, 0.0)      # no row below h == H-1
            d = jnp.dot(s.astype(jnp.bfloat16), m3_ref[i],
                        preferred_element_type=jnp.float32)
            acc = d if acc is None else acc + d
        y3 = acc + b3t_ref[...]                  # bias added once (no zeros+add init)
        y3_ref[...] = y3

        # Per-tile partial sums for BatchNorm (per (w, c) lane; folded over w and
        # finalized in the wrapper -- BN is a cross-tile reduction).
        ssum = jnp.sum(y3, axis=0, keepdims=True)
        ssq = jnp.sum(y3 * y3, axis=0, keepdims=True)
        stats_ref[0:1, 0:1, :] = ssum.reshape(1, 1, WCout)
        stats_ref[0:1, 1:2, :] = ssq.reshape(1, 1, WCout)

    y3, stats = pl.pallas_call(
        conv_stage_kernel,
        out_shape=(jax.ShapeDtypeStruct((BH, WCout), jnp.float32),
                   jax.ShapeDtypeStruct((nb, 2, WCout), jnp.float32)),
        grid_spec=pltpu.PrefetchScalarGridSpec(
            num_scalar_prefetch=0,
            grid=(nb,),
            in_specs=[
                pl.BlockSpec((R, WCin), lambda i: (i, 0)),          # x tile
                pl.BlockSpec((WCin, WCout), lambda i: (0, 0)),      # m1 (resident)
                pl.BlockSpec((1, WCout), lambda i: (0, 0)),         # b1 tiled
                pl.BlockSpec((3, WCout, WCout), lambda i: (0, 0, 0)),  # m3 (resident)
                pl.BlockSpec((1, WCout), lambda i: (0, 0)),         # b3 tiled
            ],
            out_specs=[
                pl.BlockSpec((R, WCout), lambda i: (i, 0)),         # y3 tile
                pl.BlockSpec((1, 2, WCout), lambda i: (i, 0, 0)),   # per-tile stats
            ],
            scratch_shapes=[pltpu.VMEM((R + 2, WCout), jnp.float32)],
        ),
        compiler_params=cparams,
    )(x2d, packed["m1"], packed["b1t"], packed["m3"], packed["b3t"])

    # ---- tiny XLA glue: finalize BatchNorm batch statistics (Cout scalars) ---
    count = B * H * W
    sums = stats.sum(axis=0).reshape(2, W, Cout).sum(axis=1)     # (2, Cout)
    mean = sums[0] / count
    var = sums[1] / count - mean * mean                          # biased (training-mode)
    inv_std = lax.rsqrt(var + BN_EPS)
    scale = packed["gamma"] * inv_std
    shift = packed["beta"] - mean * scale
    scale_t = jnp.tile(scale.reshape(1, -1), (1, W))             # (1, W*Cout)
    shift_t = jnp.tile(shift.reshape(1, -1), (1, W))

    # ------------- kernel 2: BN affine -> GELU(erf) -> conv1x1end ------------
    def bn_gelu_conv_kernel(y3_ref, scale_ref, shift_ref, m5_ref, b5t_ref, o_ref):
        bn = y3_ref[...] * scale_ref[...] + shift_ref[...]
        g = 0.5 * bn * (1.0 + lax.erf(bn * _INV_SQRT2))          # exact (erf) GELU
        out = jnp.dot(g.astype(jnp.bfloat16), m5_ref[...],
                      preferred_element_type=jnp.float32) + b5t_ref[...]
        o_ref[...] = out

    out2d = pl.pallas_call(
        bn_gelu_conv_kernel,
        out_shape=jax.ShapeDtypeStruct((BH, WCout), jnp.float32),
        grid_spec=pltpu.PrefetchScalarGridSpec(
            num_scalar_prefetch=0,
            grid=(nb,),
            in_specs=[
                pl.BlockSpec((R, WCout), lambda i: (i, 0)),         # y3 tile
                pl.BlockSpec((1, WCout), lambda i: (0, 0)),         # BN scale tiled
                pl.BlockSpec((1, WCout), lambda i: (0, 0)),         # BN shift tiled
                pl.BlockSpec((WCout, WCout), lambda i: (0, 0)),     # m5 (resident)
                pl.BlockSpec((1, WCout), lambda i: (0, 0)),         # b5 tiled
            ],
            out_specs=pl.BlockSpec((R, WCout), lambda i: (i, 0)),
        ),
        compiler_params=cparams,
    )(y3, scale_t, shift_t, packed["m5"], packed["b5t"])

    return out2d.reshape(B, H, W, Cout).transpose(0, 3, 1, 2)    # back to NCHW


# ----------------------------------------------------------------------------
# Params / reference
# ----------------------------------------------------------------------------
def init_params(key, in_channels, out_channels):
    """Deterministic synthetic parameters in PyTorch-convention shapes."""
    ks = jax.random.split(key, 8)
    s = 0.1
    w1 = s * jax.random.normal(ks[0], (out_channels, in_channels, 1, 1), jnp.float32)
    b1 = s * jax.random.normal(ks[1], (out_channels,), jnp.float32)
    w3 = s * jax.random.normal(ks[2], (out_channels, out_channels, 3, 3), jnp.float32)
    b3 = s * jax.random.normal(ks[3], (out_channels,), jnp.float32)
    gamma = 1.0 + s * jax.random.normal(ks[4], (out_channels,), jnp.float32)
    beta = s * jax.random.normal(ks[5], (out_channels,), jnp.float32)
    w5 = s * jax.random.normal(ks[6], (out_channels, out_channels, 1, 1), jnp.float32)
    b5 = s * jax.random.normal(ks[7], (out_channels,), jnp.float32)
    return dict(w1=w1, b1=b1, w3=w3, b3=b3, gamma=gamma, beta=beta, w5=w5, b5=b5)


def reference_forward(x, p):
    """Pure-JAX f32 reference with identical training-mode semantics."""
    b = lambda v: v[None, :, None, None]
    y = jnp.einsum("bchw,oc->bohw", x, p["w1"][:, :, 0, 0]) + b(p["b1"])
    y = lax.conv_general_dilated(
        y, p["w3"], window_strides=(1, 1), padding="SAME",
        dimension_numbers=("NCHW", "OIHW", "NCHW")) + b(p["b3"])
    mean = y.mean(axis=(0, 2, 3), keepdims=True)
    var = ((y - mean) ** 2).mean(axis=(0, 2, 3), keepdims=True)
    y = (y - mean) * lax.rsqrt(var + BN_EPS) * b(p["gamma"]) + b(p["beta"])
    y = 0.5 * y * (1.0 + lax.erf(y * _INV_SQRT2))
    y = jnp.einsum("bchw,oc->bohw", y, p["w5"][:, :, 0, 0]) + b(p["b5"])
    return y


if __name__ == "__main__":
    B, Cin, Cout, H, W = 2, 4, 8, 16, 16
    key = jax.random.PRNGKey(0)
    kx, kp = jax.random.split(key)
    x = jax.random.normal(kx, (B, Cin, H, W), jnp.float32)

    raw = init_params(kp, Cin, Cout)
    packed = pack_params(raw, W)

    fwd = jax.jit(cnn_block_forward)
    out = jax.block_until_ready(fwd(x, packed))
    assert out.shape == (B, Cout, H, W), out.shape

    # Loose sanity check vs an f32 XLA reference (kernel uses bf16 matmul operands).
    ref = jax.block_until_ready(reference_forward(x, raw))
    max_err = float(jnp.max(jnp.abs(out - ref)))
    assert max_err < 8e-2, f"max abs err {max_err}"
    print("KERNEL_OK")
</pallas_src>

<mosaic_0001>
module attributes {stable_mosaic.version = 11 : i64} {
  func.func @bn_gelu_conv_kernel(%arg0: i32, %arg1: memref<16x128xf32, #tpu.memory_space<vmem>>, %arg2: memref<1x128xf32, #tpu.memory_space<vmem>>, %arg3: memref<1x128xf32, #tpu.memory_space<vmem>>, %arg4: memref<128x128xbf16, #tpu.memory_space<vmem>>, %arg5: memref<1x128xf32, #tpu.memory_space<vmem>>, %arg6: memref<16x128xf32, #tpu.memory_space<vmem>>) attributes {dimension_semantics = [#tpu.dimension_semantics<parallel>], iteration_bounds = array<i64: 2>, scalar_prefetch = 0 : i64, scratch_operands = 0 : i64, tpu.core_type = #tpu.core_type<tc>, window_params = [{transform_indices = @transform_0, window_bounds = array<i64: 16, 128>}, {pipeline_mode = #tpu.pipeline_mode<synchronous>, transform_indices = @transform_1, window_bounds = array<i64: 1, 128>}, {pipeline_mode = #tpu.pipeline_mode<synchronous>, transform_indices = @transform_2, window_bounds = array<i64: 1, 128>}, {pipeline_mode = #tpu.pipeline_mode<synchronous>, transform_indices = @transform_3, window_bounds = array<i64: 128, 128>}, {pipeline_mode = #tpu.pipeline_mode<synchronous>, transform_indices = @transform_4, window_bounds = array<i64: 1, 128>}, {transform_indices = @transform_5, window_bounds = array<i64: 16, 128>}]} {
    %c0 = arith.constant 0 : index
    %c0_0 = arith.constant 0 : index
    %0 = vector.load %arg1[%c0, %c0_0] : memref<16x128xf32, #tpu.memory_space<vmem>>, vector<16x128xf32>
    %c0_1 = arith.constant 0 : index
    %c0_2 = arith.constant 0 : index
    %1 = vector.load %arg2[%c0_1, %c0_2] : memref<1x128xf32, #tpu.memory_space<vmem>>, vector<1x128xf32>
    %2 = vector.broadcast %1 : vector<1x128xf32> to vector<16x128xf32>
    %3 = arith.mulf %0, %2 : vector<16x128xf32>
    %c0_3 = arith.constant 0 : index
    %c0_4 = arith.constant 0 : index
    %4 = vector.load %arg3[%c0_3, %c0_4] : memref<1x128xf32, #tpu.memory_space<vmem>>, vector<1x128xf32>
    %5 = vector.broadcast %4 : vector<1x128xf32> to vector<16x128xf32>
    %6 = arith.addf %3, %5 : vector<16x128xf32>
    %cst = arith.constant 5.000000e-01 : f32
    %7 = vector.broadcast %cst : f32 to vector<16x128xf32>
    %8 = arith.mulf %7, %6 : vector<16x128xf32>
    %cst_5 = arith.constant 0.707106769 : f32
    %9 = vector.broadcast %cst_5 : f32 to vector<16x128xf32>
    %10 = arith.mulf %6, %9 : vector<16x128xf32>
    %11 = math.erf %10 : vector<16x128xf32>
    %cst_6 = arith.constant 1.000000e+00 : f32
    %12 = vector.broadcast %cst_6 : f32 to vector<16x128xf32>
    %13 = arith.addf %12, %11 : vector<16x128xf32>
    %14 = arith.mulf %8, %13 : vector<16x128xf32>
    %15 = arith.truncf %14 : vector<16x128xf32> to vector<16x128xbf16>
    %c0_7 = arith.constant 0 : index
    %c0_8 = arith.constant 0 : index
    %16 = vector.load %arg4[%c0_7, %c0_8] : memref<128x128xbf16, #tpu.memory_space<vmem>>, vector<128x128xbf16>
    %cst_9 = arith.constant dense<0.000000e+00> : vector<16x128xf32>
    %17 = tpu.matmul %15, %16, %cst_9 {dimension_numbers = #tpu.dot_dimension_numbers<[1], [0], [0], [1], [0, 0, 1, 1], [], []>} : vector<16x128xbf16>, vector<128x128xbf16>, vector<16x128xf32> -> vector<16x128xf32>
    %c0_10 = arith.constant 0 : index
    %c0_11 = arith.constant 0 : index
    %18 = vector.load %arg5[%c0_10, %c0_11] : memref<1x128xf32, #tpu.memory_space<vmem>>, vector<1x128xf32>
    %19 = vector.broadcast %18 : vector<1x128xf32> to vector<16x128xf32>
    %20 = arith.addf %17, %19 : vector<16x128xf32>
    %c0_12 = arith.constant 0 : index
    %c0_13 = arith.constant 0 : index
    %21 = vector.load %arg6[%c0_12, %c0_13] : memref<16x128xf32, #tpu.memory_space<vmem>>, vector<16x128xf32>
    tpu.vector_store %arg6[%c0_12, %c0_13], %20 {strides = array<i32>} : memref<16x128xf32, #tpu.memory_space<vmem>>, vector<16x128xf32>,
    return
  }
  func.func @transform_0(%arg0: i32) -> (i32, i32) {
    %c0_i32 = arith.constant 0 : i32
    %c0_i32_0 = arith.constant 0 : i32
    return %arg0, %c0_i32 : i32, i32
  }
  func.func @transform_1(%arg0: i32) -> (i32, i32) {
    %c0_i32 = arith.constant 0 : i32
    %c0_i32_0 = arith.constant 0 : i32
    %c0_i32_1 = arith.constant 0 : i32
    return %c0_i32, %c0_i32_0 : i32, i32
  }
  func.func @transform_2(%arg0: i32) -> (i32, i32) {
    %c0_i32 = arith.constant 0 : i32
    %c0_i32_0 = arith.constant 0 : i32
    %c0_i32_1 = arith.constant 0 : i32
    return %c0_i32, %c0_i32_0 : i32, i32
  }
  func.func @transform_3(%arg0: i32) -> (i32, i32) {
    %c0_i32 = arith.constant 0 : i32
    %c0_i32_0 = arith.constant 0 : i32
    %c0_i32_1 = arith.constant 0 : i32
    return %c0_i32, %c0_i32_0 : i32, i32
  }
  func.func @transform_4(%arg0: i32) -> (i32, i32) {
    %c0_i32 = arith.constant 0 : i32
    %c0_i32_0 = arith.constant 0 : i32
    %c0_i32_1 = arith.constant 0 : i32
    return %c0_i32, %c0_i32_0 : i32, i32
  }
  func.func @transform_5(%arg0: i32) -> (i32, i32) {
    %c0_i32 = arith.constant 0 : i32
    %c0_i32_0 = arith.constant 0 : i32
    return %arg0, %c0_i32 : i32, i32
  }
}

module attributes {stable_mosaic.version = 11 : i64} {
  func.func @conv_stage_kernel(%arg0: i32, %arg1: memref<16x64xbf16, #tpu.memory_space<vmem>>, %arg2: memref<64x128xbf16, #tpu.memory_space<vmem>>, %arg3: memref<1x128xf32, #tpu.memory_space<vmem>>, %arg4: memref<3x128x128xbf16, #tpu.memory_space<vmem>>, %arg5: memref<1x128xf32, #tpu.memory_space<vmem>>, %arg6: memref<16x128xf32, #tpu.memory_space<vmem>>, %arg7: memref<1x2x128xf32, #tpu.memory_space<vmem>>, %arg8: memref<18x128xf32, #tpu.memory_space<vmem>>) attributes {dimension_semantics = [#tpu.dimension_semantics<parallel>], iteration_bounds = array<i64: 2>, scalar_prefetch = 0 : i64, scratch_operands = 1 : i64, tpu.core_type = #tpu.core_type<tc>, window_params = [{transform_indices = @transform_0, window_bounds = array<i64: 16, 64>}, {pipeline_mode = #tpu.pipeline_mode<synchronous>, transform_indices = @transform_1, window_bounds = array<i64: 64, 128>}, {pipeline_mode = #tpu.pipeline_mode<synchronous>, transform_indices = @transform_2, window_bounds = array<i64: 1, 128>}, {pipeline_mode = #tpu.pipeline_mode<synchronous>, transform_indices = @transform_3, window_bounds = array<i64: 3, 128, 128>}, {pipeline_mode = #tpu.pipeline_mode<synchronous>, transform_indices = @transform_4, window_bounds = array<i64: 1, 128>}, {transform_indices = @transform_5, window_bounds = array<i64: 16, 128>}, {transform_indices = @transform_6, window_bounds = array<i64: 1, 2, 128>}]} {
    %c0 = arith.constant 0 : index
    %c0_0 = arith.constant 0 : index
    %0 = vector.load %arg1[%c0, %c0_0] : memref<16x64xbf16, #tpu.memory_space<vmem>>, vector<16x64xbf16>
    %c0_1 = arith.constant 0 : index
    %c0_2 = arith.constant 0 : index
    %1 = vector.load %arg2[%c0_1, %c0_2] : memref<64x128xbf16, #tpu.memory_space<vmem>>, vector<64x128xbf16>
    %cst = arith.constant dense<0.000000e+00> : vector<16x128xf32>
    %2 = tpu.matmul %0, %1, %cst {dimension_numbers = #tpu.dot_dimension_numbers<[1], [0], [0], [1], [0, 0, 1, 1], [], []>} : vector<16x64xbf16>, vector<64x128xbf16>, vector<16x128xf32> -> vector<16x128xf32>
    %c0_3 = arith.constant 0 : index
    %c0_4 = arith.constant 0 : index
    %3 = vector.load %arg3[%c0_3, %c0_4] : memref<1x128xf32, #tpu.memory_space<vmem>>, vector<1x128xf32>
    %4 = vector.broadcast %3 : vector<1x128xf32> to vector<16x128xf32>
    %5 = arith.addf %2, %4 : vector<16x128xf32>
    %cst_5 = arith.constant 0.000000e+00 : f32
    %6 = vector.broadcast %cst_5 : f32 to vector<1x128xf32>
    %c0_6 = arith.constant 0 : index
    %c0_7 = arith.constant 0 : index
    %7 = vector.load %arg8[%c0_6, %c0_7] : memref<18x128xf32, #tpu.memory_space<vmem>>, vector<1x128xf32>
    tpu.vector_store %arg8[%c0_6, %c0_7], %6 {strides = array<i32>} : memref<18x128xf32, #tpu.memory_space<vmem>>, vector<1x128xf32>,
    %c17 = arith.constant 17 : index
    %c0_8 = arith.constant 0 : index
    %8 = vector.load %arg8[%c17, %c0_8] : memref<18x128xf32, #tpu.memory_space<vmem>>, vector<1x128xf32>
    tpu.vector_store %arg8[%c17, %c0_8], %6 {strides = array<i32>} : memref<18x128xf32, #tpu.memory_space<vmem>>, vector<1x128xf32>,
    %c1 = arith.constant 1 : index
    %c0_9 = arith.constant 0 : index
    %9 = vector.load %arg8[%c1, %c0_9] : memref<18x128xf32, #tpu.memory_space<vmem>>, vector<16x128xf32>
    tpu.vector_store %arg8[%c1, %c0_9], %5 {strides = array<i32>} : memref<18x128xf32, #tpu.memory_space<vmem>>, vector<16x128xf32>,
    %10 = tpu.iota {dimensions = array<i32: 0>} : vector<16x1xi32>
    %c16_i32 = arith.constant 16 : i32
    %c0_i32 = arith.constant 0 : i32
    %11 = arith.cmpi eq, %c16_i32, %c0_i32 : i32
    %c1_i32 = arith.constant 1 : i32
    %12 = arith.select %11, %c1_i32, %c16_i32 : i32
    %13 = vector.broadcast %12 : i32 to vector<16x1xi32>
    %14 = arith.remsi %10, %13 : vector<16x1xi32>
    %c0_i32_10 = arith.constant 0 : i32
    %15 = vector.broadcast %c0_i32_10 : i32 to vector<16x1xi32>
    %16 = arith.cmpi ne, %14, %15 : vector<16x1xi32>
    %c0_i32_11 = arith.constant 0 : i32
    %17 = vector.broadcast %c0_i32_11 : i32 to vector<16x1xi32>
    %18 = arith.cmpi slt, %14, %17 : vector<16x1xi32>
    %c0_i32_12 = arith.constant 0 : i32
    %19 = arith.cmpi slt, %12, %c0_i32_12 : i32
    %20 = vector.broadcast %19 : i1 to vector<16x1xi1>
    %21 = vector.broadcast %20 : vector<16x1xi1> to vector<16x1xi1>
    %22 = arith.xori %18, %21 : vector<16x1xi1>
    %23 = arith.andi %22, %16 : vector<16x1xi1>
    %24 = vector.broadcast %12 : i32 to vector<16x1xi32>
    %25 = arith.addi %14, %24 : vector<16x1xi32>
    %26 = arith.select %23, %25, %14 : vector<16x1xi1>, vector<16x1xi32>
    %c0_13 = arith.constant 0 : index
    %c0_14 = arith.constant 0 : index
    %27 = vector.load %arg8[%c0_13, %c0_14] : memref<18x128xf32, #tpu.memory_space<vmem>>, vector<16x128xf32>
    %c0_i32_15 = arith.constant 0 : i32
    %28 = vector.broadcast %c0_i32_15 : i32 to vector<16x1xi32>
    %29 = arith.cmpi sgt, %26, %28 : vector<16x1xi32>
    %cst_16 = arith.constant 0.000000e+00 : f32
    %30 = vector.shape_cast %29 : vector<16x1xi1> to vector<16x1xi1>
    %31 = vector.broadcast %30 : vector<16x1xi1> to vector<16x128xi1>
    %32 = vector.broadcast %cst_16 : f32 to vector<16x128xf32>
    %33 = arith.select %31, %27, %32 : vector<16x128xi1>, vector<16x128xf32>
    %34 = arith.truncf %33 : vector<16x128xf32> to vector<16x128xbf16>
    %c0_17 = arith.constant 0 : index
    %c0_18 = arith.constant 0 : index
    %c0_19 = arith.constant 0 : index
    %35 = vector.load %arg4[%c0_17, %c0_18, %c0_19] : memref<3x128x128xbf16, #tpu.memory_space<vmem>>, vector<1x128x128xbf16>
    %36 = vector.shape_cast %35 : vector<1x128x128xbf16> to vector<128x128xbf16>
    %cst_20 = arith.constant dense<0.000000e+00> : vector<16x128xf32>
    %37 = tpu.matmul %34, %36, %cst_20 {dimension_numbers = #tpu.dot_dimension_numbers<[1], [0], [0], [1], [0, 0, 1, 1], [], []>} : vector<16x128xbf16>, vector<128x128xbf16>, vector<16x128xf32> -> vector<16x128xf32>
    %c1_21 = arith.constant 1 : index
    %c0_22 = arith.constant 0 : index
    %38 = vector.load %arg8[%c1_21, %c0_22] : memref<18x128xf32, #tpu.memory_space<vmem>>, vector<16x128xf32>
    %39 = arith.truncf %38 : vector<16x128xf32> to vector<16x128xbf16>
    %c1_23 = arith.constant 1 : index
    %c0_24 = arith.constant 0 : index
    %c0_25 = arith.constant 0 : index
    %40 = vector.load %arg4[%c1_23, %c0_24, %c0_25] : memref<3x128x128xbf16, #tpu.memory_space<vmem>>, vector<1x128x128xbf16>
    %41 = vector.shape_cast %40 : vector<1x128x128xbf16> to vector<128x128xbf16>
    %cst_26 = arith.constant dense<0.000000e+00> : vector<16x128xf32>
    %42 = tpu.matmul %39, %41, %cst_26 {dimension_numbers = #tpu.dot_dimension_numbers<[1], [0], [0], [1], [0, 0, 1, 1], [], []>} : vector<16x128xbf16>, vector<128x128xbf16>, vector<16x128xf32> -> vector<16x128xf32>
    %43 = arith.addf %37, %42 : vector<16x128xf32>
    %c2 = arith.constant 2 : index
    %c0_27 = arith.constant 0 : index
    %44 = vector.load %arg8[%c2, %c0_27] : memref<18x128xf32, #tpu.memory_space<vmem>>, vector<16x128xf32>
    %c15_i32 = arith.constant 15 : i32
    %45 = vector.broadcast %c15_i32 : i32 to vector<16x1xi32>
    %46 = arith.cmpi slt, %26, %45 : vector<16x1xi32>
    %cst_28 = arith.constant 0.000000e+00 : f32
    %47 = vector.shape_cast %46 : vector<16x1xi1> to vector<16x1xi1>
    %48 = vector.broadcast %47 : vector<16x1xi1> to vector<16x128xi1>
    %49 = vector.broadcast %cst_28 : f32 to vector<16x128xf32>
    %50 = arith.select %48, %44, %49 : vector<16x128xi1>, vector<16x128xf32>
    %51 = arith.truncf %50 : vector<16x128xf32> to vector<16x128xbf16>
    %c2_29 = arith.constant 2 : index
    %c0_30 = arith.constant 0 : index
    %c0_31 = arith.constant 0 : index
    %52 = vector.load %arg4[%c2_29, %c0_30, %c0_31] : memref<3x128x128xbf16, #tpu.memory_space<vmem>>, vector<1x128x128xbf16>
    %53 = vector.shape_cast %52 : vector<1x128x128xbf16> to vector<128x128xbf16>
    %cst_32 = arith.constant dense<0.000000e+00> : vector<16x128xf32>
    %54 = tpu.matmul %51, %53, %cst_32 {dimension_numbers = #tpu.dot_dimension_numbers<[1], [0], [0], [1], [0, 0, 1, 1], [], []>} : vector<16x128xbf16>, vector<128x128xbf16>, vector<16x128xf32> -> vector<16x128xf32>
    %55 = arith.addf %43, %54 : vector<16x128xf32>
    %c0_33 = arith.constant 0 : index
    %c0_34 = arith.constant 0 : index
    %56 = vector.load %arg5[%c0_33, %c0_34] : memref<1x128xf32, #tpu.memory_space<vmem>>, vector<1x128xf32>
    %57 = vector.broadcast %56 : vector<1x128xf32> to vector<16x128xf32>
    %58 = arith.addf %55, %57 : vector<16x128xf32>
    %c0_35 = arith.constant 0 : index
    %c0_36 = arith.constant 0 : index
    %59 = vector.load %arg6[%c0_35, %c0_36] : memref<16x128xf32, #tpu.memory_space<vmem>>, vector<16x128xf32>
    tpu.vector_store %arg6[%c0_35, %c0_36], %58 {strides = array<i32>} : memref<16x128xf32, #tpu.memory_space<vmem>>, vector<16x128xf32>,
    %cst_37 = arith.constant dense<0.000000e+00> : vector<128xf32>
    %60 = vector.multi_reduction <add>, %58, %cst_37 [0] : vector<16x128xf32> to vector<128xf32>
    %61 = vector.shape_cast %60 : vector<128xf32> to vector<1x128xf32>
    %62 = arith.mulf %58, %58 : vector<16x128xf32>
    %cst_38 = arith.constant dense<0.000000e+00> : vector<128xf32>
    %63 = vector.multi_reduction <add>, %62, %cst_38 [0] : vector<16x128xf32> to vector<128xf32>
    %64 = vector.shape_cast %63 : vector<128xf32> to vector<1x128xf32>
    %65 = vector.shape_cast %61 : vector<1x128xf32> to vector<1x1x128xf32>
    %c0_39 = arith.constant 0 : index
    %c0_40 = arith.constant 0 : index
    %c0_41 = arith.constant 0 : index
    %66 = vector.load %arg7[%c0_39, %c0_40, %c0_41] : memref<1x2x128xf32, #tpu.memory_space<vmem>>, vector<1x1x128xf32>
    tpu.vector_store %arg7[%c0_39, %c0_40, %c0_41], %65 {strides = array<i32>} : memref<1x2x128xf32, #tpu.memory_space<vmem>>, vector<1x1x128xf32>,
    %67 = vector.shape_cast %64 : vector<1x128xf32> to vector<1x1x128xf32>
    %c0_42 = arith.constant 0 : index
    %c1_43 = arith.constant 1 : index
    %c0_44 = arith.constant 0 : index
    %68 = vector.load %arg7[%c0_42, %c1_43, %c0_44] : memref<1x2x128xf32, #tpu.memory_space<vmem>>, vector<1x1x128xf32>
    tpu.vector_store %arg7[%c0_42, %c1_43, %c0_44], %67 {strides = array<i32>} : memref<1x2x128xf32, #tpu.memory_space<vmem>>, vector<1x1x128xf32>,
    return
  }
  func.func @transform_0(%arg0: i32) -> (i32, i32) {
    %c0_i32 = arith.constant 0 : i32
    %c0_i32_0 = arith.constant 0 : i32
    return %arg0, %c0_i32 : i32, i32
  }
  func.func @transform_1(%arg0: i32) -> (i32, i32) {
    %c0_i32 = arith.constant 0 : i32
    %c0_i32_0 = arith.constant 0 : i32
    %c0_i32_1 = arith.constant 0 : i32
    return %c0_i32, %c0_i32_0 : i32, i32
  }
  func.func @transform_2(%arg0: i32) -> (i32, i32) {
    %c0_i32 = arith.constant 0 : i32
    %c0_i32_0 = arith.constant 0 : i32
    %c0_i32_1 = arith.constant 0 : i32
    return %c0_i32, %c0_i32_0 : i32, i32
  }
  func.func @transform_3(%arg0: i32) -> (i32, i32, i32) {
    %c0_i32 = arith.constant 0 : i32
    %c0_i32_0 = arith.constant 0 : i32
    %c0_i32_1 = arith.constant 0 : i32
    %c0_i32_2 = arith.constant 0 : i32
    return %c0_i32, %c0_i32_0, %c0_i32_1 : i32, i32, i32
  }
  func.func @transform_4(%arg0: i32) -> (i32, i32) {
    %c0_i32 = arith.constant 0 : i32
    %c0_i32_0 = arith.constant 0 : i32
    %c0_i32_1 = arith.constant 0 : i32
    return %c0_i32, %c0_i32_0 : i32, i32
  }
  func.func @transform_5(%arg0: i32) -> (i32, i32) {
    %c0_i32 = arith.constant 0 : i32
    %c0_i32_0 = arith.constant 0 : i32
    return %arg0, %c0_i32 : i32, i32
  }
  func.func @transform_6(%arg0: i32) -> (i32, i32, i32) {
    %c0_i32 = arith.constant 0 : i32
    %c0_i32_0 = arith.constant 0 : i32
    %c0_i32_1 = arith.constant 0 : i32
    return %arg0, %c0_i32, %c0_i32_0 : i32, i32, i32
  }
}

</mosaic_0001>

<bundles_post_ra>
// kernel: cnn_block_forward.3
= control target key start
LH: loop header
LB: loop body
LE: loop exit
PB: predicated region body
PF: predicated region fallthrough
CT: control target
= control target key end

     0   :  { %s543_s18 = smov 0   ;;  %s600_s0 = inlined_call_operand.vmem [shape: f32[32,128], index: 0, kind: input, shape index: {}]   ;;  %s601_s1 = inlined_call_operand.vmem [shape: f32[1,128], index: 1, kind: input, shape index: {}]   ;;  %s602_s2 = inlined_call_operand.vmem [shape: f32[1,128], index: 2, kind: input, shape index: {}]   ;;  %s603_s3 = inlined_call_operand.vmem [shape: bf16[128,128], index: 3, kind: input, shape index: {}]   ;;  %s604_s4 = inlined_call_operand.vmem [shape: f32[1,128], index: 4, kind: input, shape index: {}]   ;;  %s605_s5 = inlined_call_operand.vmem [shape: f32[32,128], index: 5, kind: output, shape index: {}]  }
   0x1 LB: > { %s430_s19 = sadd.s32 4294967295, %s509_s18   ;;  %p434_p0 = scmp.ge.s32.totalorder %s509_s18, 1  ;;  %s509_s18 = sphi %s543_s18, %s15_s18  }
   0x2   : > { %p188_p1 = scmp.lt.s32.totalorder %s509_s18, 3 }
   0x4   : > { %p189_p2 = pnand %p434_p0, %p188_p1 }
   0x5   : > { %s435_s24 = sshll.u32 (!%p189_p2), %s430_s19, 1 }
   0x6   : > { %192 = sbr.rel (%p189_p2) target bundleno = 244 (0xf4), region = 40  ;;  %p217_p3 = scmp.lt.s32.totalorder (!%p189_p2), %s435_s24, 3 }
   0xb   : > { %v491_v0 = vld [vmem:[%s603_s3 + $0x38] sm:$0xff]   ;;  %v511_v1 = vmov 0.0   ;;  %v492_v2 = vld [vmem:[%s603_s3 + $0x30] sm:$0xff]   ;;  %vm512_vm0 = vmmov 0   ;;  %s607_s24 = smov (!%p217_p3, %s435_s24), 3  ;;  %v493_v3 = vld [vmem:[%s603_s3 + $0x28] sm:$0xff]  }
   0xc   : > { %461 = vmatprep.subr.bf16.mxu0 %v511_v1  ;;  %477 = vmatprep.mubr.msk.bf16.mxu0 %vm512_vm0, %v511_v1  ;;  %s436_s27 = sshll.u32 %s607_s24, 3  ;;  %v439_v4 = vld [vmem:[%s601_s1] ss:$0 sm:$0xff]  ;;  %v495_v13 = vld [vmem:[%s603_s3 + $0x18] sm:$0xff]   ;;  %v496_v16 = vld [vmem:[%s603_s3 + $0x10] sm:$0xff]  }
   0xd   : > { %462 = vmatpush3.bf16.msra.mxu0 %v491_v0  ;;  %s220_s30 = scalar_lea.vmem %s600_s0, %s436_s27  ;;  %v440_v7 = vld [vmem:[%s602_s2] ss:$0 sm:$0xff]  ;;  %v497_v17 = vld [vmem:[%s603_s3 + $0x8] sm:$0xff]   ;;  %s226_s26 = scalar_lea.vmem %s605_s5, %s436_s27 }
   0xe   : > { %463 = vmatprep.subr.bf16.mxu0 %v511_v1  ;;  %v229_v5 = vld [vmem:[%s220_s30] sm:$0xff]  ;;  %v230_v6 = vld [vmem:[%s220_s30 + $0x8] sm:$0xff] }
   0xf   : > { %v494_v8 = vld [vmem:[%s603_s3 + $0x20] sm:$0xff]   ;;  %v238_v9 = vmul.f32 %v439_v4, %v229_v5  ;;  %v239_v10 = vmul.f32 %v439_v4, %v230_v6 }
  0x10   : > { %v498_v18 = vld [vmem:[%s603_s3] sm:$0xff]  }
  0x11   : > { %464 = vmatpush3.bf16.msra.mxu0 %v492_v2  ;;  %v247_v11 = vadd.f32 %v440_v7, %v238_v9  ;;  %v248_v12 = vadd.f32 %v440_v7, %v239_v10  ;;  %v441_v28 = vld [vmem:[%s604_s4] ss:$0 sm:$0xff] }
  0x12   : > { %465 = vmatprep.subr.bf16.mxu0 %v511_v1 }
  0x13   : > { %v251_v14 = vmul.f32 0.70710677, %v247_v11  ;;  %v252_v15 = vmul.f32 0.70710677, %v248_v12  ;;  %v249_v19 = vmul.f32 0.5, %v247_v11  ;;  %v250_v21 = vmul.f32 0.5, %v248_v12 }
  0x15   : > { %466 = vmatpush3.bf16.msra.mxu0 %v493_v3  ;;  %499 = verf.f32 %v251_v14 }
  0x16   : > { %467 = vmatprep.subr.bf16.mxu0 %v511_v1  ;;  %501 = verf.f32 %v252_v15 }
  0x19   : > { %468 = vmatpush3.bf16.msra.mxu0 %v494_v8 }
  0x1a   : > { %469 = vmatprep.subr.bf16.mxu0 %v511_v1 }
  0x1d   : > { %470 = vmatpush3.bf16.msra.mxu0 %v495_v13 }
  0x1e   : > { %471 = vmatprep.subr.bf16.mxu0 %v511_v1 }
  0x21   : > { %472 = vmatpush3.bf16.msra.mxu0 %v496_v16 }
  0x22   : > { %473 = vmatprep.subr.bf16.mxu0 %v511_v1  ;;  %v500_v20 = vpop.eup %499 }
  0x23   : > { %v502_v22 = vpop.eup %501  ;;  %v255_v23 = vadd.f32 1.0, %v500_v20 }
  0x24   : > { %v256_v24 = vadd.f32 1.0, %v502_v22 }
  0x25   : > { %474 = vmatpush3.bf16.msra.mxu0 %v497_v17  ;;  %v257_v25 = vmul.f32 %v255_v23, %v249_v19 }
  0x26   : > { %475 = vmatprep.subr.bf16.mxu0 %v511_v1  ;;  %v258_v26 = vmul.f32 %v256_v24, %v250_v21 }
  0x28   : > { %v259_v27 = vpack.c.bf16 %v258_v26, %v257_v25 }
  0x29   : > { %476 = vmatpush3.bf16.msra.mxu0 %v498_v18 }
  0x2c   : > { %478 = vmatmul.mubr.bf16.vlgmr.msra.gmra.mxu0 %v259_v27 }
  0xec   : > { %v365_v29 = vpop.f32.mrf.mxu0 }
  0xed   : > { %v366_v30 = vadd.f32 %v441_v28, %v365_v29 }
  0xee   : > { %v479_v31 = vpop.f32.mrf.mxu0 }
  0xef   : > { %372 = vst [vmem:[%s226_s26] sm:$0xff] %v366_v30 }
  0xf0   : > { %v368_v32 = vpop.f32.mrf.mxu0 }
  0xf1   : > { %v369_v33 = vadd.f32 %v441_v28, %v368_v32 }
  0xf2   : > { %v480_v34 = vpop.f32.mrf.mxu0 }
  0xf3   : > { %373 = vst [vmem:[%s226_s26 + $0x8] sm:$0xff] %v369_v33 }
  0xf4 PF: > { %s15_s18 = sadd.s32 1, %s509_s18  }
  0xf5   : > { %p12_p4 = scmp.ge.s32.totalorder %s15_s18, 4  }
  0xf7   :  { %14 = sbr.rel (!%p12_p4) target bundleno = 1 (0x1), region = 70 }

// kernel: cnn_block_forward.2
= control target key start
LH: loop header
LB: loop body
LE: loop exit
PB: predicated region body
PF: predicated region fallthrough
CT: control target
= control target key end

     0   :  { %s1121_s21 = smov 0   ;;  %s1280_s0 = inlined_call_operand.vmem [shape: bf16[32,64], index: 0, kind: input, shape index: {}]   ;;  %s1281_s1 = inlined_call_operand.vmem [shape: bf16[64,128], index: 1, kind: input, shape index: {}]   ;;  %s1282_s2 = inlined_call_operand.vmem [shape: f32[1,128], index: 2, kind: input, shape index: {}]   ;;  %s1283_s3 = inlined_call_operand.vmem [shape: bf16[3,128,128], index: 3, kind: input, shape index: {}]   ;;  %s1284_s4 = inlined_call_operand.vmem [shape: f32[1,128], index: 4, kind: input, shape index: {}]   ;;  %s1285_s5 = inlined_call_operand.vmem [shape: f32[32,128], index: 5, kind: output, shape index: {0}]   ;;  %s1286_s6 = inlined_call_operand.vmem [shape: f32[2,2,128], index: 6, kind: output, shape index: {1}]  }
   0x1 LB: > { %s1127_s22 = sadd.s32 4294967295, %s1081_s21   ;;  %p853_p0 = scmp.ge.s32.totalorder %s1081_s21, 1  ;;  %s1081_s21 = sphi %s1121_s21, %s17_s21  }
   0x2   : > { %p216_p1 = scmp.lt.s32.totalorder %s1081_s21, 3 }
   0x4   : > { %p217_p2 = pnand %p853_p0, %p216_p1 }
   0x5   : > { %s854_s27 = sshll.u32 (!%p217_p2), %s1127_s22, 1  ;;  %p262_p4 = scmp.lt.s32.totalorder (!%p217_p2), %s1127_s22, 1 }
   0x6   : > { %220 = sbr.rel (%p217_p2) target bundleno = 479 (0x1df), region = 40  ;;  %p251_p3 = scmp.lt.s32.totalorder (!%p217_p2), %s854_s27, 3 }
   0xb   : > { %v1046_v0 = vld [vmem:[%s1281_s1 + $0x18] sm:$0xff]   ;;  %v1083_v1 = vmov 0.0   ;;  %v1047_v2 = vld [vmem:[%s1281_s1 + $0x10] sm:$0xff]   ;;  %vm1084_vm0 = vmmov 0   ;;  %v1048_v4 = vld [vmem:[%s1281_s1 + $0x8] sm:$0xff]   ;;  %s1288_s27 = smov (!%p251_p3, %s854_s27), 3  ;;  %v362_v23 = vlaneseq }
   0xc   : > { %963 = vmatprep.subr.bf16.mxu0 %v1083_v1  ;;  %358 = vst [vmem:[#allocation2] sm:$0x1] %v1083_v1  ;;  %359 = vst [vmem:[#allocation2 + $0x11] sm:$0x1] %v1083_v1  ;;  %975 = vmatprep.subr.bf16.mxu1 %v1083_v1  ;;  %v1051_v3 = vld [vmem:[%s1283_s3 + $0x78] sm:$0xff]   ;;  %v1053_v5 = vld [vmem:[%s1283_s3 + $0x70] sm:$0xff]  }
   0xd   : > { %964 = vmatpush3.bf16.msra.mxu0 %v1046_v0  ;;  %971 = vmatprep.mubr.msk.bf16.mxu0 %vm1084_vm0, %v1083_v1  ;;  %s855_s10 = sshll.u32 %s1288_s27, 2  ;;  %v1049_v6 = vld [vmem:[%s1281_s1] sm:$0xff]   ;;  %v1055_v7 = vld [vmem:[%s1283_s3 + $0x68] sm:$0xff]   ;;  %v1052_v9 = vld [vmem:[%s1283_s3 + $0x38] sm:$0xff]   ;;  %vm313_vm1 = vcmask 523264   ;;  %v363_v27 = vshrl.u32 %v362_v23, 7 }
   0xe   : > { %965 = vmatprep.subr.bf16.mxu0 %v1083_v1  ;;  %991 = vmatprep.mubr.msk.bf16.mxu1 %vm1084_vm0, %v1083_v1  ;;  %s254_s13 = scalar_lea.vmem %s1280_s0, %s855_s10  ;;  %v1057_v10 = vld [vmem:[%s1283_s3 + $0x60] sm:$0xff]   ;;  %v1054_v11 = vld [vmem:[%s1283_s3 + $0x30] sm:$0xff]   ;;  %v1056_v12 = vld [vmem:[%s1283_s3 + $0x28] sm:$0xff]   ;;  %vm1085_vm3 = vmmov 1   ;;  %s857_s20 = sshll.u32 %s1288_s27, 3 }
   0xf   : > { %976 = vmatpush3.bf16.msra.mxu1 %v1051_v3  ;;  %v1050_v8 = vld [vmem:[%s254_s13] sm:$0xff]   ;;  %v1059_v14 = vld [vmem:[%s1283_s3 + $0x58] sm:$0xff]   ;;  %v1061_v15 = vld [vmem:[%s1283_s3 + $0x50] sm:$0xff]   ;;  %v369_v31 = vand.u32 15, %v363_v27  ;;  %v364_v42 = vadd.s32 8, %v363_v27  ;;  %s260_s28 = scalar_lea.vmem %s1285_s5, %s857_s20  ;;  %s1290_s22 = smov (!%p262_p4, %s1127_s22), 1 }
  0x10   : > { %977 = vmatprep.subr.bf16.mxu1 %v1083_v1  ;;  %v1058_v13 = vld [vmem:[%s1283_s3 + $0x20] sm:$0xff]   ;;  %v1063_v16 = vld [vmem:[%s1283_s3 + $0x48] sm:$0xff]   ;;  %v1060_v17 = vld [vmem:[%s1283_s3 + $0x18] sm:$0xff]   ;;  %s858_s27 = sshll.u32 %s1290_s22, 1 }
  0x11   : > { %966 = vmatpush3.bf16.msra.mxu0 %v1047_v2  ;;  %v1065_v18 = vld [vmem:[%s1283_s3 + $0x40] sm:$0xff]   ;;  %v1062_v19 = vld [vmem:[%s1283_s3 + $0x10] sm:$0xff]   ;;  %v1064_v20 = vld [vmem:[%s1283_s3 + $0x8] sm:$0xff]   ;;  %vm391_vm2 = vcmp.gt.s32.totalorder %v369_v31, 0  ;;  %v376_v44 = vand.u32 15, %v364_v42  ;;  %s265_s7 = scalar_lea.vmem %s1286_s6, %s858_s27 }
  0x12   : > { %967 = vmatprep.subr.bf16.mxu0 %v1083_v1  ;;  %v1066_v21 = vld [vmem:[%s1283_s3] sm:$0xff]   ;;  %v1067_v32 = vld [vmem:[%s1283_s3 + $0xb8] sm:$0xff]   ;;  %v1068_v34 = vld [vmem:[%s1283_s3 + $0xb0] sm:$0xff]  }
  0x13   : > { %978 = vmatpush3.bf16.msra.mxu1 %v1053_v5  ;;  %v859_v22 = vld [vmem:[%s1282_s2] ss:$0 sm:$0xff]  ;;  %vm898_vm4 = vmpackc.low %vm1085_vm3, %vm391_vm2  ;;  %v1069_v37 = vld [vmem:[%s1283_s3 + $0xa8] sm:$0xff]   ;;  %vm617_vm5 = vcmp.lt.s32.totalorder %v376_v44, 15 }
  0x14   : > { %979 = vmatprep.subr.bf16.mxu1 %v1083_v1  ;;  %v1070_v39 = vld [vmem:[%s1283_s3 + $0xa0] sm:$0xff]   ;;  %v1071_v40 = vld [vmem:[%s1283_s3 + $0x98] sm:$0xff]   ;;  %v1072_v41 = vld [vmem:[%s1283_s3 + $0x90] sm:$0xff]  }
  0x15   : > { %968 = vmatpush3.bf16.msra.mxu0 %v1048_v4  ;;  %v1073_v43 = vld [vmem:[%s1283_s3 + $0x88] sm:$0xff]   ;;  %v1074_v45 = vld [vmem:[%s1283_s3 + $0x80] sm:$0xff]   ;;  %vm925_vm6 = vmpackc.low %vm617_vm5, %vm1085_vm3 }
  0x16   : > { %969 = vmatprep.subr.bf16.mxu0 %v1083_v1  ;;  %v928_v59 = vld [vmem:[%s1284_s4] ss:$0 sm:$0xff] }
  0x17   : > { %980 = vmatpush3.bf16.msra.mxu1 %v1055_v7 }
  0x18   : > { %981 = vmatprep.subr.bf16.mxu1 %v1083_v1 }
  0x19   : > { %970 = vmatpush3.bf16.msra.mxu0 %v1049_v6 }
  0x1a   : > { %995 = vmatprep.subr.bf16.mxu0 %v1083_v1 }
  0x1b   : > { %982 = vmatpush3.bf16.msra.mxu1 %v1057_v10 }
  0x1c   : > { %972 = vmatmul.mubr.msk.bf16.vlgmr.msra.gmra.mxu0 %vm313_vm1, %v1050_v8  ;;  %983 = vmatprep.subr.bf16.mxu1 %v1083_v1 }
  0x1d   : > { %996 = vmatpush3.bf16.msra.mxu0 %v1052_v9  ;;  %1011 = vmatprep.mubr.msk.bf16.mxu0 %vm1084_vm0, %v1083_v1 }
  0x1e   : > { %997 = vmatprep.subr.bf16.mxu0 %v1083_v1 }
  0x1f   : > { %984 = vmatpush3.bf16.msra.mxu1 %v1059_v14 }
  0x20   : > { %985 = vmatprep.subr.bf16.mxu1 %v1083_v1 }
  0x21   : > { %998 = vmatpush3.bf16.msra.mxu0 %v1054_v11 }
  0x22   : > { %999 = vmatprep.subr.bf16.mxu0 %v1083_v1 }
  0x23   : > { %986 = vmatpush3.bf16.msra.mxu1 %v1061_v15 }
  0x24   : > { %987 = vmatprep.subr.bf16.mxu1 %v1083_v1 }
  0x25   : > { %1000 = vmatpush3.bf16.msra.mxu0 %v1056_v12 }
  0x26   : > { %1001 = vmatprep.subr.bf16.mxu0 %v1083_v1 }
  0x27   : > { %988 = vmatpush3.bf16.msra.mxu1 %v1063_v16 }
  0x28   : > { %989 = vmatprep.subr.bf16.mxu1 %v1083_v1 }
  0x29   : > { %1002 = vmatpush3.bf16.msra.mxu0 %v1058_v13 }
  0x2a   : > { %1003 = vmatprep.subr.bf16.mxu0 %v1083_v1 }
  0x2b   : > { %990 = vmatpush3.bf16.msra.mxu1 %v1065_v18 }
  0x2c   : > { %1015 = vmatprep.subr.bf16.mxu1 %v1083_v1 }
  0x2d   : > { %1004 = vmatpush3.bf16.msra.mxu0 %v1060_v17 }
  0x2e   : > { %1005 = vmatprep.subr.bf16.mxu0 %v1083_v1 }
  0x31   : > { %1006 = vmatpush3.bf16.msra.mxu0 %v1062_v19 }
  0x32   : > { %1007 = vmatprep.subr.bf16.mxu0 %v1083_v1 }
  0x35   : > { %1008 = vmatpush3.bf16.msra.mxu0 %v1064_v20 }
  0x36   : > { %1009 = vmatprep.subr.bf16.mxu0 %v1083_v1 }
  0x39   : > { %1010 = vmatpush3.bf16.msra.mxu0 %v1066_v21 }
  0xdc   : > { %v351_v24 = vpop.f32.mrf.mxu0 }
  0xdd   : > { %v352_v25 = vadd.f32 %v859_v22, %v351_v24 }
  0xde   : > { %v973_v26 = vpop.f32.mrf.mxu0 }
  0xdf   : > { %360 = vst [vmem:[#allocation2 + $0x1] sm:$0xff] %v352_v25 }
  0xe0   : > { %v354_v28 = vpop.f32.mrf.mxu0 }
  0xe1   : > { %v355_v29 = vadd.f32 %v859_v22, %v354_v28 }
  0xe2   : > { %v974_v30 = vpop.f32.mrf.mxu0 }
  0xe3   : > { %361 = vst [vmem:[#allocation2 + $0x9] sm:$0xff] %v355_v29  ;;  %v418_v33 = vpack.c.bf16 %v355_v29, %v352_v25 }
  0xe5   : > { %992 = vmatmul.mubr.bf16.vlgmr.msra.gmra.mxu1 %v418_v33 }
  0xe6   : > { %1016 = vmatpush3.bf16.msra.mxu1 %v1067_v32  ;;  %1031 = vmatprep.mubr.msk.bf16.mxu1 %vm1084_vm0, %v1083_v1  ;;  %v389_v35 = vld [vmem:[#allocation2] sm:$0xff] }
  0xe7   : > { %1017 = vmatprep.subr.bf16.mxu1 %v1083_v1 }
  0xea   : > { %v390_v36 = vld [vmem:[#allocation2 + $0x8] sm:$0xff]  ;;  %1018 = vmatpush3.bf16.msra.mxu1 %v1068_v34 }
  0xeb   : > { %v899_v38 = vpack.c.bf16 %v390_v36, %v389_v35  ;;  %1019 = vmatprep.subr.bf16.mxu1 %v1083_v1  ;;  %v614_v46 = vld [vmem:[#allocation2 + $0x2] sm:$0xff]  ;;  %v615_v47 = vld [vmem:[#allocation2 + $0xa] sm:$0xff] }
  0xec   : > { %v926_v48 = vpack.c.bf16 %v615_v47, %v614_v46 }
  0xed   : > { %1012 = vmatmul.mubr.msk.bf16.vlgmr.msra.gmra.mxu0 %vm898_vm4, %v899_v38 }
  0xee   : > { %1020 = vmatpush3.bf16.msra.mxu1 %v1069_v37 }
  0xef   : > { %1021 = vmatprep.subr.bf16.mxu1 %v1083_v1 }
  0xf2   : > { %1022 = vmatpush3.bf16.msra.mxu1 %v1070_v39 }
  0xf3   : > { %1023 = vmatprep.subr.bf16.mxu1 %v1083_v1 }
  0xf6   : > { %1024 = vmatpush3.bf16.msra.mxu1 %v1071_v40 }
  0xf7   : > { %1025 = vmatprep.subr.bf16.mxu1 %v1083_v1 }
  0xfa   : > { %1026 = vmatpush3.bf16.msra.mxu1 %v1072_v41 }
  0xfb   : > { %1027 = vmatprep.subr.bf16.mxu1 %v1083_v1 }
  0xfe   : > { %1028 = vmatpush3.bf16.msra.mxu1 %v1073_v43 }
  0xff   : > { %1029 = vmatprep.subr.bf16.mxu1 %v1083_v1 }
 0x102   : > { %1030 = vmatpush3.bf16.msra.mxu1 %v1074_v45 }
 0x105   : > { %1032 = vmatmul.mubr.msk.bf16.vlgmr.msra.gmra.mxu1 %vm925_vm6, %v926_v48 }
 0x1a5   : > { %v518_v49 = vpop.f32.mrf.mxu1 }
 0x1a7   : > { %v993_v50 = vpop.f32.mrf.mxu1 }
 0x1a9   : > { %v521_v51 = vpop.f32.mrf.mxu1 }
 0x1ab   : > { %v994_v52 = vpop.f32.mrf.mxu1 }
 0x1ad   : > { %v607_v53 = vpop.f32.mrf.mxu0 }
 0x1ae   : > { %v608_v57 = vadd.f32 %v607_v53, %v518_v49 }
 0x1af   : > { %v1013_v54 = vpop.f32.mrf.mxu0 }
 0x1b1   : > { %v610_v55 = vpop.f32.mrf.mxu0 }
 0x1b2   : > { %v611_v62 = vadd.f32 %v610_v55, %v521_v51 }
 0x1b3   : > { %v1014_v56 = vpop.f32.mrf.mxu0 }
 0x1c5   : > { %v724_v58 = vpop.f32.mrf.mxu1 }
 0x1c6   : > { %v731_v60 = vadd.f32 %v724_v58, %v608_v57 }
 0x1c7   : > { %v1033_v61 = vpop.f32.mrf.mxu1 }
 0x1c8   : > { %v740_v63 = vadd.f32 %v928_v59, %v731_v60 }
 0x1c9   : > { %v727_v0 = vpop.f32.mrf.mxu1 }
 0x1ca   : > { %742 = vst [vmem:[%s260_s28] sm:$0xff] %v740_v63  ;;  %v732_v1 = vadd.f32 %v727_v0, %v611_v62  ;;  %v751_v4 = vmul.f32 %v740_v63, %v740_v63 }
 0x1cb   : > { %v1034_v2 = vpop.f32.mrf.mxu1 }
 0x1cc   : > { %v741_v3 = vadd.f32 %v928_v59, %v732_v1 }
 0x1ce   : > { %743 = vst [vmem:[%s260_s28 + $0x8] sm:$0xff] %v741_v3  ;;  %v744_v5 = vadd.f32 %v741_v3, %v740_v63  ;;  %v752_v6 = vmul.f32 %v741_v3, %v741_v3 }
 0x1d0   : > { %v745_v7 = vrot.slane %v744_v5, 4  ;;  %v753_v8 = vadd.f32 %v752_v6, %v751_v4 }
 0x1d2   : > { %v746_v9 = vadd.f32 %v745_v7, %v744_v5  ;;  %v754_v10 = vrot.slane %v753_v8, 4 }
 0x1d4   : > { %v747_v11 = vrot.slane %v746_v9, 2  ;;  %v755_v12 = vadd.f32 %v754_v10, %v753_v8 }
 0x1d6   : > { %v748_v13 = vadd.f32 %v747_v11, %v746_v9  ;;  %v756_v14 = vrot.slane %v755_v12, 2 }
 0x1d8   : > { %v749_v15 = vrot.slane %v748_v13, 1  ;;  %v757_v16 = vadd.f32 %v756_v14, %v755_v12 }
 0x1da   : > { %v750_v17 = vadd.f32 %v749_v15, %v748_v13  ;;  %v758_v18 = vrot.slane %v757_v16, 1 }
 0x1dc   : > { %v759_v19 = vadd.f32 %v758_v18, %v757_v16  ;;  %760 = vst [vmem:[%s265_s7] sm:$0x1] %v750_v17 }
 0x1de   : > { %761 = vst [vmem:[%s265_s7 + $0x1] sm:$0x1] %v759_v19 }
 0x1df PF: > { %s17_s21 = sadd.s32 1, %s1081_s21  }
 0x1e0   : > { %p14_p5 = scmp.ge.s32.totalorder %s17_s21, 4  }
 0x1e2   :  { %16 = sbr.rel (!%p14_p5) target bundleno = 1 (0x1), region = 84 }

</bundles_post_ra>
